<compile_context>
chip_gen: v7x
topology: tpu7x:2x2x1
jax: 0.10.0
libtpu: 0.0.40
codegen_flags: <defaults>
</compile_context>

<pallas_src>
import functools

import jax
import jax.numpy as jnp
from jax.experimental import pallas as pl
from jax.experimental.pallas import tpu as pltpu


def _round_up(x, m):
    return ((x + m - 1) // m) * m


def _linear_kernel(x_ref, w_ref, b_ref, o_ref, *, activation):
    """o[i, j] = activation(x[i] @ W[:, j] + b[j]) for one (row, feature) tile."""
    acc = jnp.dot(x_ref[...], w_ref[...], preferred_element_type=jnp.float32)
    acc = acc + b_ref[...]
    if activation is not None:
        acc = activation(acc)
    o_ref[...] = acc.astype(o_ref.dtype)


def linear_pallas(x, w, b, *, activation=None, out_dtype=jnp.float32,
                  tm=512, tn=2048, vmem_budget=40 * 1024 * 1024):
    """out = activation(x @ w + b), streaming w from HBM exactly once.

    x: (N, K) small-row activations (prefix tokens).
    w: (K, F) weight (the large, bandwidth-dominating operand).
    b: (1, F) or (F,) bias.
    Returns (N, F) in out_dtype.
    """
    N, K = x.shape
    F = w.shape[1]
    b = b.reshape(1, F)

    # Row tile: multiple of 16 (bf16 sublane packing). When N <= tm the row
    # grid axis collapses to 1 and W is streamed exactly once.
    tm_cap = max(16, (tm // 16) * 16)
    tm_e = min(tm_cap, _round_up(N, 16))
    n_pad = _round_up(N, tm_e)

    # Out-feature tile: lane-dense multiple of 128, shrunk until the
    # double-buffered working set fits the VMEM budget (v7x-safe).
    tn_cap = _round_up(F, 128)
    tn_e = min(max(128, (tn // 128) * 128), tn_cap)

    def _working_set(tn_):
        w_tile = 2 * K * tn_ * 2                                  # bf16 W, 2 bufs
        x_tile = 2 * tm_e * K * 2                                 # bf16 x, 2 bufs
        o_tile = 2 * tm_e * tn_ * jnp.dtype(out_dtype).itemsize   # out, 2 bufs
        b_tile = 2 * tn_ * 4                                      # f32 bias, 2 bufs
        return w_tile + x_tile + o_tile + b_tile

    while tn_e > 128 and _working_set(tn_e) > vmem_budget:
        tn_e = max(128, ((tn_e // 2) // 128) * 128)
    f_pad = _round_up(F, tn_e)

    # Cast / pad only when actually needed (weights are expected to arrive
    # pre-cast to bf16 and pre-padded from init; x is per-call and tiny).
    if x.dtype != jnp.bfloat16:
        x = x.astype(jnp.bfloat16)
    if n_pad != N:
        x = jnp.pad(x, ((0, n_pad - N), (0, 0)))
    if w.dtype != jnp.bfloat16:
        w = w.astype(jnp.bfloat16)
    if b.dtype != jnp.float32:
        b = b.astype(jnp.float32)
    if f_pad != F:
        w = jnp.pad(w, ((0, 0), (0, f_pad - F)))
        b = jnp.pad(b, ((0, 0), (0, f_pad - F)))

    # Grid: out-feature axis OUTER, row axis INNER -> W's block index (0, j)
    # is constant across the inner axis, so W is fetched from HBM once per j
    # (exactly once in total). Both axes are state-free -> "parallel".
    grid = (f_pad // tn_e, n_pad // tm_e)

    kernel = functools.partial(_linear_kernel, activation=activation)
    vmem_limit = int(min(max(_working_set(tn_e) + (8 << 20), 32 << 20), 48 << 20))

    out = pl.pallas_call(
        kernel,
        out_shape=jax.ShapeDtypeStruct((n_pad, f_pad), out_dtype),
        grid_spec=pltpu.PrefetchScalarGridSpec(
            num_scalar_prefetch=0,
            grid=grid,
            in_specs=[
                pl.BlockSpec((tm_e, K), lambda j, i: (i, 0)),    # x row tile
                pl.BlockSpec((K, tn_e), lambda j, i: (0, j)),    # W j-tile (constant over i)
                pl.BlockSpec((1, tn_e), lambda j, i: (0, j)),    # b j-tile
            ],
            out_specs=pl.BlockSpec((tm_e, tn_e), lambda j, i: (i, j)),
        ),
        compiler_params=pltpu.CompilerParams(
            dimension_semantics=("parallel", "parallel"),
            vmem_limit_bytes=vmem_limit,
        ),
    )(x, w, b)

    if n_pad != N or f_pad != F:
        out = out[:N, :F]
    return out


class PrefixEncoderPallas:
    """JAX/Pallas port of the PyTorch PrefixEncoder module.

    prefix_projection=True:  out = Linear2(tanh(Linear1(Embed(prefix))))
    prefix_projection=False: out = Embed(prefix)
    """

    def __init__(self, config, key):
        self.prefix_projection = config["prefix_projection"]
        H = config["hidden_size"]
        O = config["num_hidden_layers"] * 2 * H
        self.out_features = O
        k0, k1, k2, k3, k4 = jax.random.split(key, 5)
        if self.prefix_projection:
            P = config["prefix_hidden_size"]
            # f32 master parameters (shapes follow the torch __init__); these
            # are what the pure-JAX reference uses.
            self.embedding = 0.02 * jax.random.normal(
                k0, (config["pre_seq_len"], H), jnp.float32)
            self.w1 = 0.1 * jax.random.normal(k1, (H, P), jnp.float32)
            self.b1 = 0.1 * jax.random.normal(k2, (1, P), jnp.float32)
            self.w2 = 0.1 * jax.random.normal(k3, (P, O), jnp.float32)
            self.b2 = 0.1 * jax.random.normal(k4, (1, O), jnp.float32)
            # Kernel-side copies: bf16 cast + pad to lane-dense 128-multiples
            # ONCE here (not per forward). Zero-padded P columns give
            # tanh(0 + 0) = 0 in h, and the matching zero rows of W2
            # contribute nothing, so results are unchanged.
            p_pad = _round_up(P, 128)
            o_pad = _round_up(O, 128)
            self._w1_k = jnp.pad(self.w1, ((0, 0), (0, p_pad - P))).astype(jnp.bfloat16)
            self._b1_k = jnp.pad(self.b1, ((0, 0), (0, p_pad - P)))
            self._w2_k = jnp.pad(self.w2, ((0, p_pad - P), (0, o_pad - O))).astype(jnp.bfloat16)
            self._b2_k = jnp.pad(self.b2, ((0, 0), (0, o_pad - O)))
        else:
            self.embedding = 0.02 * jax.random.normal(
                k0, (config["pre_seq_len"], O), jnp.float32)

    def __call__(self, prefix):
        # prefix: (B, L) int32 token ids
        B, L = prefix.shape
        if self.prefix_projection:
            # The embedding gather stays in XLA: fusing it in-kernel would
            # force per-row grid steps and break the large row tile; it is a
            # tiny (B*L, H) lookup next to the multi-MB/GB W2 stream.
            tokens = jnp.take(self.embedding, prefix.reshape(-1), axis=0)   # (B*L, H)
            h = linear_pallas(tokens, self._w1_k, self._b1_k,
                              activation=jnp.tanh, out_dtype=jnp.bfloat16)  # (B*L, P_pad)
            out = linear_pallas(h, self._w2_k, self._b2_k,
                                activation=None, out_dtype=jnp.float32)     # (B*L, O_pad)
            if out.shape[1] != self.out_features:
                out = out[:, :self.out_features]
            return out.reshape(B, L, self.out_features)
        # TODO(synk): the no-projection branch is a pure embedding gather with
        # no matmul/reduction hot path, so it stays a plain XLA gather.
        return jnp.take(self.embedding, prefix.reshape(-1), axis=0).reshape(B, L, -1)


def _reference_forward(enc, prefix):
    """Pure-JAX f32 reference for correctness checking."""
    B, L = prefix.shape
    t = jnp.take(enc.embedding, prefix.reshape(-1), axis=0)
    if enc.prefix_projection:
        h = jnp.tanh(t @ enc.w1 + enc.b1)
        t = h @ enc.w2 + enc.b2
    return t.reshape(B, L, -1)


if __name__ == "__main__":
    config = dict(
        prefix_projection=True,
        pre_seq_len=16,
        hidden_size=32,
        prefix_hidden_size=64,
        num_hidden_layers=2,   # output feature dim = 2 * 2 * 32 = 128
    )
    key = jax.random.PRNGKey(0)
    k_params, k_ids = jax.random.split(key)

    enc = PrefixEncoderPallas(config, k_params)

    # B*L = 14 is deliberately NOT a multiple of the 16-row tile: exercises
    # the ragged-row padding path.
    B, L = 2, 7
    prefix = jax.random.randint(k_ids, (B, L), 0, config["pre_seq_len"], jnp.int32)

    out = jax.block_until_ready(enc(prefix))
    ref = _reference_forward(enc, prefix)
    assert out.shape == (B, L, 2 * config["num_hidden_layers"] * config["hidden_size"])
    # bf16 MXU operands (f32 accumulation / bias / tanh) vs pure-f32 reference.
    assert jnp.allclose(out, ref, atol=2e-2, rtol=2e-2), "mismatch vs JAX reference"

    # Also check the no-projection (embedding-only) branch.
    config_np = dict(config, prefix_projection=False)
    enc_np = PrefixEncoderPallas(config_np, k_params)
    out_np = jax.block_until_ready(enc_np(prefix))
    ref_np = _reference_forward(enc_np, prefix)
    assert out_np.shape == ref_np.shape
    assert jnp.allclose(out_np, ref_np, atol=1e-6, rtol=1e-6)

    print("KERNEL_OK")
</pallas_src>

<mosaic_0001>
module attributes {stable_mosaic.version = 11 : i64} {
  func.func @_linear_kernel(%arg0: i32, %arg1: i32, %arg2: memref<16x32xbf16, #tpu.memory_space<vmem>>, %arg3: memref<32x128xbf16, #tpu.memory_space<vmem>>, %arg4: memref<1x128xf32, #tpu.memory_space<vmem>>, %arg5: memref<16x128xbf16, #tpu.memory_space<vmem>>) attributes {dimension_semantics = [#tpu.dimension_semantics<parallel>, #tpu.dimension_semantics<parallel>], iteration_bounds = array<i64: 1, 1>, scalar_prefetch = 0 : i64, scratch_operands = 0 : i64, tpu.core_type = #tpu.core_type<tc>, window_params = [{transform_indices = @transform_0, window_bounds = array<i64: 16, 32>}, {transform_indices = @transform_1, window_bounds = array<i64: 32, 128>}, {transform_indices = @transform_2, window_bounds = array<i64: 1, 128>}, {transform_indices = @transform_3, window_bounds = array<i64: 16, 128>}]} {
    %c0 = arith.constant 0 : index
    %c0_0 = arith.constant 0 : index
    %0 = vector.load %arg2[%c0, %c0_0] : memref<16x32xbf16, #tpu.memory_space<vmem>>, vector<16x32xbf16>
    %c0_1 = arith.constant 0 : index
    %c0_2 = arith.constant 0 : index
    %1 = vector.load %arg3[%c0_1, %c0_2] : memref<32x128xbf16, #tpu.memory_space<vmem>>, vector<32x128xbf16>
    %cst = arith.constant dense<0.000000e+00> : vector<16x128xf32>
    %2 = tpu.matmul %0, %1, %cst {dimension_numbers = #tpu.dot_dimension_numbers<[1], [0], [0], [1], [0, 0, 1, 1], [], []>} : vector<16x32xbf16>, vector<32x128xbf16>, vector<16x128xf32> -> vector<16x128xf32>
    %c0_3 = arith.constant 0 : index
    %c0_4 = arith.constant 0 : index
    %3 = vector.load %arg4[%c0_3, %c0_4] : memref<1x128xf32, #tpu.memory_space<vmem>>, vector<1x128xf32>
    %4 = vector.broadcast %3 : vector<1x128xf32> to vector<16x128xf32>
    %5 = arith.addf %2, %4 : vector<16x128xf32>
    %6 = math.tanh %5 : vector<16x128xf32>
    %7 = arith.truncf %6 : vector<16x128xf32> to vector<16x128xbf16>
    %c0_5 = arith.constant 0 : index
    %c0_6 = arith.constant 0 : index
    %8 = vector.load %arg5[%c0_5, %c0_6] : memref<16x128xbf16, #tpu.memory_space<vmem>>, vector<16x128xbf16>
    tpu.vector_store %arg5[%c0_5, %c0_6], %7 {strides = array<i32>} : memref<16x128xbf16, #tpu.memory_space<vmem>>, vector<16x128xbf16>,
    return
  }
  func.func @transform_0(%arg0: i32, %arg1: i32) -> (i32, i32) {
    %c0_i32 = arith.constant 0 : i32
    %c0_i32_0 = arith.constant 0 : i32
    return %arg1, %c0_i32 : i32, i32
  }
  func.func @transform_1(%arg0: i32, %arg1: i32) -> (i32, i32) {
    %c0_i32 = arith.constant 0 : i32
    %c0_i32_0 = arith.constant 0 : i32
    return %c0_i32, %arg0 : i32, i32
  }
  func.func @transform_2(%arg0: i32, %arg1: i32) -> (i32, i32) {
    %c0_i32 = arith.constant 0 : i32
    %c0_i32_0 = arith.constant 0 : i32
    return %c0_i32, %arg0 : i32, i32
  }
  func.func @transform_3(%arg0: i32, %arg1: i32) -> (i32, i32) {
    %c0_i32 = arith.constant 0 : i32
    return %arg1, %arg0 : i32, i32
  }
}

</mosaic_0001>

<bundles_post_ra>
// kernel: tpu_custom_call.1
= control target key start
LH: loop header
LB: loop body
LE: loop exit
PB: predicated region body
PF: predicated region fallthrough
CT: control target
= control target key end

     0   :  { %8 = vsyncpa [#allocation3], 0  ;;  %s335_s0 = inlined_call_operand.hbm [shape: bf16[16,32], index: 0, kind: input, shape index: {}]   ;;  %s336_s1 = inlined_call_operand.hbm [shape: bf16[32,128], index: 1, kind: input, shape index: {}]   ;;  %s337_s2 = inlined_call_operand.vmem [shape: f32[1,128], index: 2, kind: input, shape index: {}]   ;;  %s338_s3 = inlined_call_operand.hbm [shape: bf16[16,128], index: 3, kind: output, shape index: {}]  }
   0x1   :  { %9 = vsyncpa [#allocation6], 0 }
   0x2   :  { %10 = vsyncpa [#allocation4], 0  ;;  %s260_s12 = smov [#allocation2]   ;;  %s188_s16 = scalar_lea.hbm %s335_s0, 128 }
   0x3   :  { %s16_s13 = sshll.u32 %s260_s12, 4  ;;  %p189_p0 = scmp.ne.s32.totalorder %s335_s0, %s188_s16  ;;  %s17_s13 = int_to_ptr.vmem [resolvable:$true] %s16_s13 }
   0x4   :  { %p192_p1 = scmp.lt.u32.totalorder %s188_s16, %s335_s0 }
   0x6   :  { %p194_p2 = pnand %p192_p1, %p189_p0 }
   0x8   :  { %197 = shalt.err (!%p194_p2)
}
   0x9   :  { %s198_s21 = scalar_lea.vmem %s17_s13, 128  ;;  %p203_p4 = scmp.lt.s32.totalorder %s17_s13, %s17_s13 }
   0xa   :  { %p199_p3 = scmp.ne.s32.totalorder %s17_s13, %s198_s21  ;;  %p204_p5 = scmp.lt.s32.totalorder %s198_s21, %s198_s21 }
   0xc   :  { %p205_p6 = por %p204_p5, %p203_p4 }
   0xe   :  { %p206_p7 = pnand %p205_p6, %p199_p3 }
  0x10   :  { %209 = shalt.err (!%p206_p7)
}
  0x11   :  { %s261_s22 = smov 64   ;;  %s262_s23 = smov 4  }
  0x12   :  { %22 = dma.hbm_to_vmem [thread:$0]  %s335_s0, 128, %s17_s13, [#allocation3], %s261_s22, %s261_s22, %s262_s23  }
  0x13   :  { %s263_s26 = smov [#allocation5]   ;;  %s210_s30 = scalar_lea.hbm %s336_s1, 256 }
  0x14   :  { %s28_s27 = sshll.u32 %s263_s26, 4  ;;  %p211_p8 = scmp.ne.s32.totalorder %s336_s1, %s210_s30  ;;  %s29_s27 = int_to_ptr.vmem [resolvable:$true] %s28_s27 }
  0x15   :  { %p214_p9 = scmp.lt.u32.totalorder %s210_s30, %s336_s1 }
  0x17   :  { %p216_p10 = pnand %p214_p9, %p211_p8 }
  0x19   :  { %219 = shalt.err (!%p216_p10)
}
  0x1a   :  { %s220_s8 = scalar_lea.vmem %s29_s27, 256  ;;  %p225_p12 = scmp.lt.s32.totalorder %s29_s27, %s29_s27 }
  0x1b   :  { %p221_p11 = scmp.ne.s32.totalorder %s29_s27, %s220_s8  ;;  %p226_p13 = scmp.lt.s32.totalorder %s220_s8, %s220_s8 }
  0x1d   :  { %p227_p0 = por %p226_p13, %p225_p12 }
  0x1f   :  { %p228_p1 = pnand %p227_p0, %p221_p11 }
  0x21   :  { %231 = shalt.err (!%p228_p1)
}
  0x22   :  { %34 = dma.hbm_to_vmem [thread:$0]  %s336_s1, 256, %s29_s27, [#allocation6], %s261_s22, %s261_s22, %s262_s23  }
  0x23   :  { %254 = dma.done.wait [#allocation3], 128  }
  0x24   :  { %255 = vsyncadd [#allocation3], 4294967168 }
  0x25   :  { %256 = dma.done.wait [#allocation6], 256  }
  0x26   :  { %257 = vsyncadd [#allocation6], 4294967040  ;;  %v264_v0 = vmov 0.0   ;;  %vm265_vm0 = vmmov 0   ;;  %v181_v1 = vld [vmem:[#allocation5] sm:$0xff]   ;;  %v182_v2 = vld [vmem:[#allocation5 + $0x8] sm:$0xff]  }
  0x27   :  { %166 = vmatprep.subr.bf16.mxu0 %v264_v0  ;;  %170 = vmatprep.mubr.msk.bf16.mxu0 %vm265_vm0, %v264_v0  ;;  %v183_v3 = vld [vmem:[#allocation2] sm:$0xff]   ;;  %vm74_vm1 = vcmask 261120   ;;  %s266_s1 = smov [#allocation7]  }
  0x28   :  { %167 = vmatpush3.bf16.msra.mxu0 %v181_v1  ;;  %v149_v4 = vld [vmem:[%s337_s2] ss:$0 sm:$0xff]  ;;  %s136_s12 = sshll.u32 %s266_s1, 4  ;;  %s137_s12 = int_to_ptr.vmem [resolvable:$true] %s136_s12 }
  0x29   :  { %168 = vmatprep.subr.bf16.mxu0 %v264_v0  ;;  %s232_s13 = scalar_lea.vmem %s137_s12, 128  ;;  %p237_p3 = scmp.lt.s32.totalorder %s137_s12, %s137_s12 }
  0x2a   :  { %p233_p2 = scmp.ne.s32.totalorder %s137_s12, %s232_s13  ;;  %p238_p4 = scmp.lt.s32.totalorder %s232_s13, %s232_s13 }
  0x2c   :  { %169 = vmatpush3.bf16.msra.mxu0 %v182_v2  ;;  %p239_p5 = por %p238_p4, %p237_p3 }
  0x2e   :  { %p240_p6 = pnand %p239_p5, %p233_p2 }
  0x2f   :  { %171 = vmatmul.mubr.msk.bf16.vlgmr.msra.gmra.mrb[0].mxu0 %vm74_vm1, %v183_v3 }
 0x102   :  { %v112_v5 = vpop.f32.mrb[0].mxu0 }
 0x103   :  { %v113_v6 = vadd.f32 %v149_v4, %v112_v5  ;;  %v172_v7 = vpop.f32.mrb[1].mxu0 }
 0x104   :  { %v115_v8 = vpop.f32.mrb[2].mxu0 }
 0x105   :  { %v116_v9 = vadd.f32 %v149_v4, %v115_v8  ;;  %v173_v10 = vpop.f32.mrb[3].mxu0  ;;  %184 = vtanh.f32 %v113_v6 }
 0x107   :  { %186 = vtanh.f32 %v116_v9 }
 0x10f   :  { %v185_v11 = vpop.eup %184 }
 0x111   :  { %v187_v12 = vpop.eup %186 }
 0x112   :  { %v161_v13 = vpack.c.bf16 %v187_v12, %v185_v11 }
 0x114   :  { %162 = vst [vmem:[#allocation7] sm:$0xff] %v161_v13  }
 0x115   :  { %243 = shalt.err (!%p240_p6)
}
 0x116   :  { %s244_s15 = scalar_lea.hbm %s338_s3, 128 }
 0x117   :  { %p245_p7 = scmp.ne.s32.totalorder %s338_s3, %s244_s15  ;;  %p248_p8 = scmp.lt.u32.totalorder %s244_s15, %s338_s3 }
 0x119   :  { %p250_p9 = pnand %p248_p8, %p245_p7 }
 0x11b   :  { %253 = shalt.err (!%p250_p9)
}
 0x11c   :  { %142 = dma.vmem_to_hbm [thread:$0]  %s137_s12, 128, %s338_s3, [#allocation4], %s261_s22, %s261_s22, %s262_s23  }
 0x11d   :  { %258 = dma.done.wait [#allocation4], 128  }
 0x11e   :  { %259 = vsyncadd [#allocation4], 4294967168 }
 0x11f   :  { %146 = vsyncpa [#allocation3], 1 }
 0x120   :  { %147 = vsyncpa [#allocation6], 1 }
 0x121   :  { %148 = vsyncpa [#allocation4], 1 }

</bundles_post_ra>
